<compile_context>
chip_gen: v7x
topology: tpu7x:2x2x1
jax: 0.10.0
libtpu: 0.0.40
codegen_flags: <defaults>
</compile_context>

<pallas_src>
import jax
import jax.numpy as jnp
from jax.experimental import pallas as pl
from jax.experimental.pallas import tpu as pltpu


def _round_up(x, m):
    return ((x + m - 1) // m) * m


def _patch_embed_kernel(p_ref, w_ref, b_ref, o_ref):
    # p_ref: (TM, Kp) patch tile (compute dtype), w_ref: (Kp, Ep) projection,
    # b_ref: (1, Ep) bias (f32), o_ref: (TM, Ep) output tile.
    acc = jnp.dot(p_ref[...], w_ref[...], preferred_element_type=jnp.float32)
    o_ref[...] = (acc + b_ref[...]).astype(o_ref.dtype)


def patch_embed_forward(x, weight, bias, patch_size, stride, *,
                        compute_dtype=jnp.bfloat16, out_dtype=None, tile_m=1024):
    """x: (B, C, H, W) NCHW like PyTorch.
    weight: (embed_dim, C, ph, pw), bias: (embed_dim,) -- PyTorch Conv2d layout.
    Returns (B, num_patches, embed_dim) == conv(x).flatten(2).transpose(1, 2).
    Assumes stride == patch_size (PaSST PatchEmbed default, non-overlapping).
    out_dtype=None keeps x.dtype (PyTorch semantics); pass jnp.bfloat16 to
    halve the output HBM stream when the consumer tolerates bf16 activations."""
    B, C, H, W = x.shape
    ph, pw = patch_size
    sh, sw = stride
    assert (ph, pw) == (sh, sw), "kernel assumes non-overlapping patches (stride == patch_size)"
    gh, gw = H // sh, W // sw
    # Match Conv2d VALID padding: silently drop remainder rows/cols.
    if (gh * ph, gw * pw) != (H, W):
        x = x[:, :, : gh * ph, : gw * pw]
    num_patches = gh * gw
    E = weight.shape[0]
    K = C * ph * pw
    M = B * num_patches
    if out_dtype is None:
        out_dtype = x.dtype

    # ---- patch extraction (intended to fuse into the kernel's input DMA) ----
    # (B, C, gh, ph, gw, pw) -> (B, gh, gw, C, ph, pw) -> (M, K), inner (c, kh, kw)
    patches = (
        x.reshape(B, C, gh, ph, gw, pw)
        .transpose(0, 2, 4, 1, 3, 5)
        .reshape(M, K)
        .astype(compute_dtype)
    )
    # Conv weight (E, C, ph, pw) -> (K, E)
    wmat = weight.reshape(E, K).T.astype(compute_dtype)
    brow = bias.reshape(1, E).astype(jnp.float32)

    # Lane-dense padding only when the dim is large enough that the relative
    # waste is small; small dims stay unpadded (block == full dim is legal,
    # masked stores beat an extra padded-output HBM pass).
    Kp = K if K <= 128 else _round_up(K, 128)
    Ep = E if E <= 128 else _round_up(E, 128)
    if Kp != K:
        patches = jnp.pad(patches, ((0, 0), (0, Kp - K)))
        wmat = jnp.pad(wmat, ((0, Kp - K), (0, 0)))
    if Ep != E:
        wmat = jnp.pad(wmat, ((0, 0), (0, Ep - E)))
        brow = jnp.pad(brow, ((0, 0), (0, Ep - E)))

    # M tile: big enough for long DMAs, but keep >= ~4 grid steps for large M
    # so dimension_semantics=("parallel",) can feed both v7x TensorCores.
    M8 = _round_up(M, 8)
    TM = min(tile_m, max(256, _round_up(max(M8 // 4, 8), 256)))
    TM = min(TM, M8)
    Mp = _round_up(M, TM)            # pad M so every block is full
    grid_m = Mp // TM
    if Mp != M:
        patches = jnp.pad(patches, ((0, Mp - M), (0, 0)))

    in_b = jnp.dtype(compute_dtype).itemsize
    out_b = jnp.dtype(out_dtype).itemsize

    vmem_bytes = (
        2 * TM * Kp * in_b        # double-buffered patch tiles
        + 2 * TM * Ep * out_b     # double-buffered output tiles
        + 2 * Kp * Ep * in_b      # resident projection weight (2 pipeline bufs)
        + 2 * Ep * 4              # resident bias
        + (4 << 20)               # Mosaic internal-scratch headroom
    )
    vmem_bytes = int(min(max(vmem_bytes, 8 << 20), 40 << 20))  # v7x-safe ceiling

    cost = pl.CostEstimate(
        flops=2 * Mp * Kp * Ep,
        transcendentals=0,
        bytes_accessed=(
            M * K * jnp.dtype(x.dtype).itemsize   # raw x read (transpose fused)
            + Kp * Ep * in_b                      # resident weight
            + Ep * 4                              # bias
            + Mp * Ep * out_b                     # output actually written
        ),
    )

    out_flat = pl.pallas_call(
        _patch_embed_kernel,
        out_shape=jax.ShapeDtypeStruct((Mp, Ep), out_dtype),
        grid=(grid_m,),
        in_specs=[
            pl.BlockSpec((TM, Kp), lambda i: (i, 0)),   # streamed patch tiles
            pl.BlockSpec((Kp, Ep), lambda i: (0, 0)),   # resident weight
            pl.BlockSpec((1, Ep), lambda i: (0, 0)),    # resident bias
        ],
        out_specs=pl.BlockSpec((TM, Ep), lambda i: (i, 0)),
        compiler_params=pltpu.CompilerParams(
            dimension_semantics=("parallel",),          # disjoint output tiles; megacore OK
            vmem_limit_bytes=vmem_bytes,
            allow_input_fusion=[True, False, False],    # fold patch transpose/cast into input
        ),
        cost_estimate=cost,
    )(patches, wmat, brow)

    # (Mp, Ep) -> (B, num_patches, E)   (== conv(x).flatten(2).transpose(1, 2))
    if (Mp, Ep) != (M, E):
        out_flat = out_flat[:M, :E]
    return out_flat.reshape(B, num_patches, E)


def _reference(x, weight, bias, patch_size, stride):
    # Pure-JAX reference: conv via lax.conv_general_dilated, NCHW / OIHW.
    y = jax.lax.conv_general_dilated(
        x, weight, window_strides=stride, padding="VALID",
        dimension_numbers=("NCHW", "OIHW", "NCHW"),
    )
    y = y + bias.reshape(1, -1, 1, 1)
    B, E, gh, gw = y.shape
    return y.reshape(B, E, gh * gw).transpose(0, 2, 1)


if __name__ == "__main__":
    # Small shapes consistent with the module: img_size=16, patch_size=4,
    # stride=4, in_chans=4, embed_dim=32, batch=2.
    B, C, H, W = 2, 4, 16, 16
    patch_size = (4, 4)
    stride = (4, 4)
    E = 32

    key = jax.random.PRNGKey(0)
    kx, kw, kb = jax.random.split(key, 3)
    x = jax.random.normal(kx, (B, C, H, W), dtype=jnp.float32)
    weight = jax.random.normal(kw, (E, C, patch_size[0], patch_size[1]), dtype=jnp.float32) * 0.02
    bias = jax.random.normal(kb, (E,), dtype=jnp.float32) * 0.02

    fwd = jax.jit(lambda xx, ww, bb: patch_embed_forward(xx, ww, bb, patch_size, stride))
    out = fwd(x, weight, bias)
    out = jax.block_until_ready(out)

    ref = _reference(x, weight, bias, patch_size, stride)
    assert out.shape == (B, (H // stride[0]) * (W // stride[1]), E), out.shape
    assert out.dtype == x.dtype, out.dtype
    # bf16 inputs with f32 accumulation -> looser tolerance vs. the f32 reference.
    assert jnp.allclose(out, ref, atol=2e-2, rtol=2e-2), float(jnp.max(jnp.abs(out - ref)))

    print("KERNEL_OK")
</pallas_src>

<mosaic_0001>
module attributes {stable_mosaic.version = 11 : i64} {
  func.func @_patch_embed_kernel(%arg0: i32, %arg1: memref<32x64xbf16, #tpu.memory_space<vmem>>, %arg2: memref<64x32xbf16, #tpu.memory_space<vmem>>, %arg3: memref<1x32xf32, #tpu.memory_space<vmem>>, %arg4: memref<32x32xf32, #tpu.memory_space<vmem>>) attributes {dimension_semantics = [#tpu.dimension_semantics<parallel>], iteration_bounds = array<i64: 1>, scalar_prefetch = 0 : i64, scratch_operands = 0 : i64, tpu.core_type = #tpu.core_type<tc>, window_params = [{transform_indices = @transform_0, window_bounds = array<i64: 32, 64>}, {pipeline_mode = #tpu.pipeline_mode<synchronous>, transform_indices = @transform_1, window_bounds = array<i64: 64, 32>}, {pipeline_mode = #tpu.pipeline_mode<synchronous>, transform_indices = @transform_2, window_bounds = array<i64: 1, 32>}, {transform_indices = @transform_3, window_bounds = array<i64: 32, 32>}]} {
    %c0 = arith.constant 0 : index
    %c0_0 = arith.constant 0 : index
    %0 = vector.load %arg1[%c0, %c0_0] : memref<32x64xbf16, #tpu.memory_space<vmem>>, vector<32x64xbf16>
    %c0_1 = arith.constant 0 : index
    %c0_2 = arith.constant 0 : index
    %1 = vector.load %arg2[%c0_1, %c0_2] : memref<64x32xbf16, #tpu.memory_space<vmem>>, vector<64x32xbf16>
    %cst = arith.constant dense<0.000000e+00> : vector<32x32xf32>
    %2 = tpu.matmul %0, %1, %cst {dimension_numbers = #tpu.dot_dimension_numbers<[1], [0], [0], [1], [0, 0, 1, 1], [], []>} : vector<32x64xbf16>, vector<64x32xbf16>, vector<32x32xf32> -> vector<32x32xf32>
    %c0_3 = arith.constant 0 : index
    %c0_4 = arith.constant 0 : index
    %3 = vector.load %arg3[%c0_3, %c0_4] : memref<1x32xf32, #tpu.memory_space<vmem>>, vector<1x32xf32>
    %4 = vector.broadcast %3 : vector<1x32xf32> to vector<32x32xf32>
    %5 = arith.addf %2, %4 : vector<32x32xf32>
    %c0_5 = arith.constant 0 : index
    %c0_6 = arith.constant 0 : index
    %6 = vector.load %arg4[%c0_5, %c0_6] : memref<32x32xf32, #tpu.memory_space<vmem>>, vector<32x32xf32>
    tpu.vector_store %arg4[%c0_5, %c0_6], %5 {strides = array<i32>} : memref<32x32xf32, #tpu.memory_space<vmem>>, vector<32x32xf32>,
    return
  }
  func.func @transform_0(%arg0: i32) -> (i32, i32) {
    %c0_i32 = arith.constant 0 : i32
    %c0_i32_0 = arith.constant 0 : i32
    return %arg0, %c0_i32 : i32, i32
  }
  func.func @transform_1(%arg0: i32) -> (i32, i32) {
    %c0_i32 = arith.constant 0 : i32
    %c0_i32_0 = arith.constant 0 : i32
    %c0_i32_1 = arith.constant 0 : i32
    return %c0_i32, %c0_i32_0 : i32, i32
  }
  func.func @transform_2(%arg0: i32) -> (i32, i32) {
    %c0_i32 = arith.constant 0 : i32
    %c0_i32_0 = arith.constant 0 : i32
    %c0_i32_1 = arith.constant 0 : i32
    return %c0_i32, %c0_i32_0 : i32, i32
  }
  func.func @transform_3(%arg0: i32) -> (i32, i32) {
    %c0_i32 = arith.constant 0 : i32
    %c0_i32_0 = arith.constant 0 : i32
    return %arg0, %c0_i32 : i32, i32
  }
}

</mosaic_0001>

<bundles_post_ra>
// kernel: _lambda_.1
= control target key start
LH: loop header
LB: loop body
LE: loop exit
PB: predicated region body
PF: predicated region fallthrough
CT: control target
= control target key end

     0   :  { %vm69_vm0 = vcmask 523264   ;;  %s262_s0 = inlined_call_operand.vmem [shape: bf16[32,64], index: 0, kind: input, shape index: {}]   ;;  %s263_s1 = inlined_call_operand.vmem [shape: bf16[64,32], index: 1, kind: input, shape index: {}]   ;;  %s264_s2 = inlined_call_operand.vmem [shape: f32[1,32], index: 2, kind: input, shape index: {}]   ;;  %s265_s3 = inlined_call_operand.hbm [shape: f32[32,32], index: 3, kind: output, shape index: {}]  }
   0x1   :  { %v176_v0 = vld [vmem:[%s263_s1] sm:$0xff]   ;;  %v177_v1 = vld [vmem:[%s263_s1 + $0x8] sm:$0xff]   ;;  %v178_v2 = vld [vmem:[%s263_s1 + $0x10] sm:$0xff]  }
   0x2   :  { %161 = vmatprep.subr.bf16.mxu0 %v176_v0  ;;  %v180_v3 = vld [vmem:[%s262_s0] sm:$0xff]  }
   0x3   :  { %162 = vmatpush3.bf16.msra.mxu0 %v176_v0  ;;  %169 = vmatprep.mubr.msk.bf16.mxu0 %vm69_vm0, %v180_v3 }
   0x4   :  { %163 = vmatprep.subr.bf16.mxu0 %v177_v1 }
   0x5   :  { %8 = vsyncpa [#allocation3], 0  ;;  %v179_v4 = vld [vmem:[%s263_s1 + $0x18] sm:$0xff]   ;;  %v181_v5 = vld [vmem:[%s262_s0 + $0x8] sm:$0xff]   ;;  %vm125_vm1 = vcmask 261120   ;;  %s206_s26 = smov [#allocation2]  }
   0x6   :  { %v146_v6 = vld [vmem:[%s264_s2] ss:$0 sm:$0xff]  ;;  %s135_s27 = sshll.u32 %s206_s26, 4  ;;  %s136_s27 = int_to_ptr.vmem [resolvable:$true] %s135_s27 }
   0x7   :  { %164 = vmatpush3.bf16.msra.mxu0 %v177_v1  ;;  %s182_s0 = scalar_lea.vmem %s136_s27, 512  ;;  %p187_p1 = scmp.lt.s32.totalorder %s136_s27, %s136_s27 }
   0x8   :  { %165 = vmatprep.subr.bf16.mxu0 %v178_v2  ;;  %p183_p0 = scmp.ne.s32.totalorder %s136_s27, %s182_s0  ;;  %p188_p2 = scmp.lt.s32.totalorder %s182_s0, %s182_s0 }
   0xa   :  { %p189_p3 = por %p188_p2, %p187_p1 }
   0xb   :  { %166 = vmatpush3.bf16.msra.mxu0 %v178_v2 }
   0xc   :  { %167 = vmatprep.subr.bf16.mxu0 %v179_v4  ;;  %p190_p4 = pnand %p189_p3, %p183_p0 }
   0xf   :  { %168 = vmatpush3.bf16.msra.mxu0 %v179_v4 }
  0x12   :  { %170 = vmatmul.mubr.msk.bf16.vlgmr.msra.gmra.mrb[0].mxu0 %vm69_vm0, %v181_v5 }
  0xe5   :  { %v171_v7 = vpop.f32.mrb[0].mxu0 }
  0xe6   :  { %v119_v8 = vadd.f32 %v171_v7, %v146_v6  ;;  %v110_v9 = vpop.f32.mrb[1].mxu0 }
  0xe7   :  { %v111_v10 = vadd.f32 %v146_v6, %v110_v9  ;;  %v172_v11 = vpop.f32.mrb[2].mxu0 }
  0xe8   :  { %128 = vst.msk [vmem:[#allocation2 + $0x10] sm:$0xff] %vm125_vm1, %v119_v8  ;;  %v122_v12 = vadd.f32 %v172_v11, %v146_v6  ;;  %v113_v13 = vpop.f32.mrb[3].mxu0 }
  0xe9   :  { %126 = vst.msk [vmem:[#allocation2] sm:$0xff] %vm125_vm1, %v111_v10  ;;  %v114_v14 = vadd.f32 %v146_v6, %v113_v13 }
  0xea   :  { %129 = vst.msk [vmem:[#allocation2 + $0x18] sm:$0xff] %vm125_vm1, %v122_v12 }
  0xeb   :  { %127 = vst.msk [vmem:[#allocation2 + $0x8] sm:$0xff] %vm125_vm1, %v114_v14 }
  0xec   :  { %193 = shalt.err (!%p190_p4)
}
  0xed   :  { %s194_s28 = scalar_lea.hbm %s265_s3, 512 }
  0xee   :  { %p195_p5 = scmp.ne.s32.totalorder %s265_s3, %s194_s28  ;;  %p198_p6 = scmp.lt.u32.totalorder %s194_s28, %s265_s3 }
  0xf0   :  { %p200_p7 = pnand %p198_p6, %p195_p5 }
  0xf2   :  { %203 = shalt.err (!%p200_p7)
}
  0xf3   :  { %s207_s6 = smov 128   ;;  %s208_s7 = smov 8  }
  0xf4   :  { %141 = dma.vmem_to_hbm [thread:$0]  %s136_s27, 512, %s265_s3, [#allocation3], %s207_s6, %s207_s6, %s208_s7  }
  0xf5   :  { %204 = dma.done.wait [#allocation3], 512  }
  0xf6   :  { %205 = vsyncadd [#allocation3], 4294966784 }
  0xf7   :  { %145 = vsyncpa [#allocation3], 1 }

</bundles_post_ra>
